<compile_context>
chip_gen: v5e
topology: v5e:2x2
jax: 0.10.0
libtpu: 0.0.40
codegen_flags: <defaults>
</compile_context>

<pallas_src>
import functools

import jax
import jax.numpy as jnp
from jax import lax
from jax.experimental import pallas as pl
from jax.experimental.pallas import tpu as pltpu

# Module "parameters" from __init__ (deterministic, no checkpoint load).
LENGTH_WEIGHT_FACTOR = 0.2
CONFIDENCE_PENALTY_FACTOR = 0.1

LANES = 128
SUBLANES = 8


def _sentiment_partials_kernel(*refs, batch, tile_rows, total_tiles,
                               tiles_per_core, needs_mask, has_lengths):
    """Accumulates per-core partial sums of base, len and base*pen."""
    if has_lengths:
        pred_ref, targ_ref, lens_ref, out_ref, acc_base, acc_len, acc_bp = refs
    else:
        pred_ref, targ_ref, out_ref, acc_base, acc_bp = refs
        lens_ref = acc_len = None

    c = pl.program_id(0)          # partial / core index ("parallel")
    i = pl.program_id(1)          # tile index within this core ("arbitrary")

    @pl.when(i == 0)
    def _init():
        acc_base[...] = jnp.zeros_like(acc_base)
        acc_bp[...] = jnp.zeros_like(acc_bp)
        if has_lengths:
            acc_len[...] = jnp.zeros_like(acc_len)

    x = pred_ref[...]             # (tile_rows, 128) logits, f32
    y = targ_ref[...]             # (tile_rows, 128) targets in {0, 1}

    if needs_mask:
        # Only the last (possibly ragged / duplicated) tiles need masking;
        # this branch is compiled only when padding or duplicate tiles exist.
        tile_elems = tile_rows * LANES
        g = c * tiles_per_core + i                      # global tile index
        valid = jnp.where(g < total_tiles, batch - g * tile_elems, 0)
        row = lax.broadcasted_iota(jnp.int32, x.shape, 0)
        lane = lax.broadcasted_iota(jnp.int32, x.shape, 1)
        mask = (row * LANES + lane) < valid
        maskf = mask.astype(jnp.float32)
        # Clamp BEFORE exp/log1p: OOB partial-block reads are unspecified and
        # NaN * 0 would not be neutralized by masking the result.
        x = jnp.where(mask, x, 0.0)
        y = jnp.where(mask, y, 0.0)

    # --- base loss: BCEWithLogitsLoss(reduction='none'), no pos_weight ---
    # stable form: max(x,0) - x*y + log1p(exp(-|x|))
    ax = jnp.abs(x)
    base = jnp.maximum(x, 0.0) - x * y + jnp.log1p(jnp.exp(-ax))
    if needs_mask:
        base = base * maskf

    # --- confidence penalty for overconfident wrong predictions ---
    # |sigmoid(x) - 0.5| * 2 == tanh(|x|/2)  (single EUP op)
    confidence = jnp.tanh(0.5 * ax)
    # pred_class = (sigmoid(x) > 0.5) == (x > 0); ties at x==0 -> class 0,
    # matching torch's (probs > 0.5).
    pred_class = (x > 0.0).astype(jnp.float32)
    correct = pred_class == y
    pen = jnp.where(correct, 0.0, confidence) * CONFIDENCE_PENALTY_FACTOR
    bp = base * pen               # base already masked -> bp masked too

    # --- accumulate into (8,128) vector partials (VALU adds only) ---
    slabs = tile_rows // SUBLANES
    acc_base[...] += jnp.sum(base.reshape(slabs, SUBLANES, LANES), axis=0)
    acc_bp[...] += jnp.sum(bp.reshape(slabs, SUBLANES, LANES), axis=0)
    if has_lengths:
        lens = lens_ref[...]
        if needs_mask:
            lens = lens * maskf
        acc_len[...] += jnp.sum(lens.reshape(slabs, SUBLANES, LANES), axis=0)

    @pl.when(i == tiles_per_core - 1)
    def _finalize():
        out_ref[0, 0] = acc_base[...]
        if has_lengths:
            out_ref[0, 1] = acc_len[...]
            out_ref[0, 2] = acc_bp[...]
        else:
            out_ref[0, 1] = acc_bp[...]


def sentiment_weighted_loss(predictions, targets, review_lengths=None, *,
                            block_rows=1024, num_partials=2):
    """Wrapper mirroring SentimentWeightedLoss.forward (glue only)."""
    # Shape-reconciliation branches from the PyTorch forward (plain-JAX glue).
    if predictions.shape != targets.shape:
        if predictions.ndim == 2 and predictions.shape[1] == 2 and targets.ndim == 1:
            predictions = predictions[:, 1].reshape(-1, 1)
        elif predictions.ndim == 2 and predictions.shape[1] == 1 and targets.ndim == 1:
            targets = targets.reshape(-1, 1)

    B = int(predictions.shape[0])
    has_lengths = review_lengths is not None

    # TODO(synk): if upstream delivers bf16, stream it natively (16-sublane
    # tiles) instead of this wrapper cast; casts below are no-ops for f32.
    p = predictions.reshape(-1)
    t = targets.reshape(-1)
    if p.dtype != jnp.float32:
        p = p.astype(jnp.float32)
    if t.dtype != jnp.float32:
        t = t.astype(jnp.float32)
    inputs = [p, t]
    if has_lengths:
        l = review_lengths.reshape(-1)
        if l.dtype != jnp.float32:
            l = l.astype(jnp.float32)
        inputs.append(l)

    # Minimal lane-dense layout: rows = ceil(B/128) rounded to 8 sublanes.
    # Zero-copy (pure reshape) whenever B is already a multiple of 1024.
    rows = -(-B // LANES)
    rows = -(-rows // SUBLANES) * SUBLANES
    pad = rows * LANES - B
    slabs2d = []
    for a in inputs:
        if pad:
            a = jnp.pad(a, (0, pad))
        slabs2d.append(a.reshape(rows, LANES))

    # Tile geometry: tile rows need NOT divide `rows` (ragged last block is
    # masked in-kernel), so no tile-multiple padding copy is ever made.
    tr = max(SUBLANES, (min(int(block_rows), rows) // SUBLANES) * SUBLANES)
    total_tiles = -(-rows // tr)
    n_cores = max(1, min(int(num_partials), total_tiles))
    tiles_per_core = -(-total_tiles // n_cores)
    needs_mask = (pad != 0) or (rows % tr != 0) or \
                 (n_cores * tiles_per_core != total_tiles)

    K = 3 if has_lengths else 2
    n_in = len(inputs)

    def in_idx(ci, ii):
        # Clamp so duplicate tiles (when total_tiles doesn't split evenly
        # across cores) still map to an in-bounds block; their contribution
        # is zeroed by the in-kernel mask.
        g = ci * tiles_per_core + ii
        return (jnp.minimum(g, total_tiles - 1), 0)

    kernel = functools.partial(
        _sentiment_partials_kernel, batch=B, tile_rows=tr,
        total_tiles=total_tiles, tiles_per_core=tiles_per_core,
        needs_mask=needs_mask, has_lengths=has_lengths)

    n_elems = rows * LANES
    cost = pl.CostEstimate(
        flops=12 * n_elems,
        transcendentals=3 * n_elems,
        bytes_accessed=n_in * n_elems * 4 + n_cores * K * SUBLANES * LANES * 4)

    params = dict(dimension_semantics=("parallel", "arbitrary"))
    in_bytes = n_in * 2 * tr * LANES * 4          # double-buffered input tiles
    if in_bytes > 8 * 1024 * 1024:
        # headroom for elementwise temporaries; stays under physical VMEM on
        # every generation
        params["vmem_limit_bytes"] = min(in_bytes * 4, 56 * 1024 * 1024)

    partials = pl.pallas_call(
        kernel,
        out_shape=jax.ShapeDtypeStruct((n_cores, K, SUBLANES, LANES),
                                       jnp.float32),
        grid_spec=pltpu.PrefetchScalarGridSpec(
            num_scalar_prefetch=0,
            grid=(n_cores, tiles_per_core),
            in_specs=[pl.BlockSpec((tr, LANES), in_idx) for _ in range(n_in)],
            out_specs=pl.BlockSpec((1, K, SUBLANES, LANES),
                                   lambda ci, ii: (ci, 0, 0, 0)),
            scratch_shapes=[pltpu.VMEM((SUBLANES, LANES), jnp.float32)
                            for _ in range(K)],
        ),
        compiler_params=pltpu.CompilerParams(**params),
        cost_estimate=cost,
    )(*slabs2d)

    # Tiny final combine (a few hundred floats) in plain JAX.
    bf = jnp.float32(B)
    sum_base = jnp.sum(partials[:, 0])
    sum_bp = jnp.sum(partials[:, K - 1])
    if has_lengths:
        sum_len = jnp.sum(partials[:, 1])
        mean_lw = ((1.0 - 0.5 * LENGTH_WEIGHT_FACTOR)
                   + LENGTH_WEIGHT_FACTOR * (sum_len / bf))
    else:
        mean_lw = jnp.float32(1.0)   # lengths absent -> weights stay 1.0
    return (sum_base / bf) * mean_lw + sum_bp / bf


def _reference(predictions, targets, review_lengths=None):
    """Pure-JAX replica of the PyTorch forward (for verification)."""
    x = predictions.reshape(-1, 1).astype(jnp.float32)      # (B, 1)
    y = targets.reshape(-1, 1).astype(jnp.float32)          # (B, 1)
    base = jnp.maximum(x, 0.0) - x * y + jnp.log1p(jnp.exp(-jnp.abs(x)))
    B = x.shape[0]
    w = jnp.ones((B,), jnp.float32)
    if review_lengths is not None:
        w = w * (1.0 + (review_lengths.reshape(-1).astype(jnp.float32) - 0.5)
                 * LENGTH_WEIGHT_FACTOR)
    probs = jax.nn.sigmoid(x)
    correct = ((probs > 0.5).astype(jnp.float32) == y).astype(jnp.float32)
    pen = (1.0 - correct) * (jnp.abs(probs - 0.5) * 2.0) * CONFIDENCE_PENALTY_FACTOR
    w = w + pen                          # (B,) + (B,1) -> (B,B), as in PyTorch
    return jnp.mean(base * w)


if __name__ == "__main__":
    key = jax.random.PRNGKey(0)
    k1, k2, k3 = jax.random.split(key, 3)

    # Test 1: ragged batch (not a multiple of 128), tiny tile -> exercises
    # the masked-tail path and the 2-way per-core partial split.
    B = 1300
    preds = jax.random.normal(k1, (B, 1), dtype=jnp.float32) * 2.0
    targs = jax.random.bernoulli(k2, 0.5, (B, 1)).astype(jnp.float32)
    lens = jax.random.uniform(k3, (B,), dtype=jnp.float32)

    out1 = jax.block_until_ready(
        sentiment_weighted_loss(preds, targs, lens, block_rows=8))
    ref1 = _reference(preds, targs, lens)
    assert jnp.allclose(out1, ref1, rtol=1e-4, atol=1e-6), (out1, ref1)

    # Test 2: review_lengths=None -> 2-input kernel variant, default tile.
    out2 = jax.block_until_ready(sentiment_weighted_loss(preds, targs))
    ref2 = _reference(preds, targs)
    assert jnp.allclose(out2, ref2, rtol=1e-4, atol=1e-6), (out2, ref2)

    # Test 3: aligned batch (zero-copy, no masking compiled), 2 partials.
    B3 = 2048
    k4, k5, k6 = jax.random.split(jax.random.PRNGKey(1), 3)
    preds3 = jax.random.normal(k4, (B3, 1), dtype=jnp.float32)
    targs3 = jax.random.bernoulli(k5, 0.5, (B3, 1)).astype(jnp.float32)
    lens3 = jax.random.uniform(k6, (B3,), dtype=jnp.float32)
    out3 = jax.block_until_ready(
        sentiment_weighted_loss(preds3, targs3, lens3, block_rows=8))
    ref3 = _reference(preds3, targs3, lens3)
    assert jnp.allclose(out3, ref3, rtol=1e-4, atol=1e-6), (out3, ref3)

    # Test 4: tile rows do NOT divide the row count -> ragged partial edge
    # block (unspecified OOB reads are clamped in-kernel).
    B4 = 2500
    k7, k8, k9 = jax.random.split(jax.random.PRNGKey(2), 3)
    preds4 = jax.random.normal(k7, (B4, 1), dtype=jnp.float32)
    targs4 = jax.random.bernoulli(k8, 0.5, (B4, 1)).astype(jnp.float32)
    lens4 = jax.random.uniform(k9, (B4,), dtype=jnp.float32)
    out4 = jax.block_until_ready(
        sentiment_weighted_loss(preds4, targs4, lens4, block_rows=16))
    ref4 = _reference(preds4, targs4, lens4)
    assert jnp.allclose(out4, ref4, rtol=1e-4, atol=1e-6), (out4, ref4)

    print("KERNEL_OK")
</pallas_src>

<mosaic_0001>
module attributes {stable_mosaic.version = 11 : i64} {
  func.func @_sentiment_partials_kernel(%arg0: i32, %arg1: i32, %arg2: memref<8x128xf32, #tpu.memory_space<vmem>>, %arg3: memref<8x128xf32, #tpu.memory_space<vmem>>, %arg4: memref<8x128xf32, #tpu.memory_space<vmem>>, %arg5: memref<1x3x8x128xf32, #tpu.memory_space<vmem>>, %arg6: memref<8x128xf32, #tpu.memory_space<vmem>>, %arg7: memref<8x128xf32, #tpu.memory_space<vmem>>, %arg8: memref<8x128xf32, #tpu.memory_space<vmem>>) attributes {dimension_semantics = [#tpu.dimension_semantics<parallel>, #tpu.dimension_semantics<arbitrary>], iteration_bounds = array<i64: 2, 1>, scalar_prefetch = 0 : i64, scratch_operands = 3 : i64, tpu.core_type = #tpu.core_type<tc>, window_params = [{transform_indices = @transform_0, window_bounds = array<i64: 8, 128>}, {transform_indices = @transform_1, window_bounds = array<i64: 8, 128>}, {transform_indices = @transform_2, window_bounds = array<i64: 8, 128>}, {transform_indices = @transform_3, window_bounds = array<i64: 1, 3, 8, 128>}]} {
    %c0_i32 = arith.constant 0 : i32
    %0 = arith.cmpi eq, %arg1, %c0_i32 : i32
    %1 = arith.extui %0 : i1 to i32
    %c0_i32_0 = arith.constant 0 : i32
    %2 = arith.cmpi ne, %1, %c0_i32_0 : i32
    scf.if %2 {
      %cst_31 = arith.constant 0.000000e+00 : f32
      %68 = vector.broadcast %cst_31 : f32 to vector<8x128xf32>
      %c0_32 = arith.constant 0 : index
      %c0_33 = arith.constant 0 : index
      %69 = vector.load %arg6[%c0_32, %c0_33] : memref<8x128xf32, #tpu.memory_space<vmem>>, vector<8x128xf32>
      tpu.vector_store %arg6[%c0_32, %c0_33], %68 {strides = array<i32>} : memref<8x128xf32, #tpu.memory_space<vmem>>, vector<8x128xf32>,
      %cst_34 = arith.constant 0.000000e+00 : f32
      %70 = vector.broadcast %cst_34 : f32 to vector<8x128xf32>
      %c0_35 = arith.constant 0 : index
      %c0_36 = arith.constant 0 : index
      %71 = vector.load %arg8[%c0_35, %c0_36] : memref<8x128xf32, #tpu.memory_space<vmem>>, vector<8x128xf32>
      tpu.vector_store %arg8[%c0_35, %c0_36], %70 {strides = array<i32>} : memref<8x128xf32, #tpu.memory_space<vmem>>, vector<8x128xf32>,
      %cst_37 = arith.constant 0.000000e+00 : f32
      %72 = vector.broadcast %cst_37 : f32 to vector<8x128xf32>
      %c0_38 = arith.constant 0 : index
      %c0_39 = arith.constant 0 : index
      %73 = vector.load %arg7[%c0_38, %c0_39] : memref<8x128xf32, #tpu.memory_space<vmem>>, vector<8x128xf32>
      tpu.vector_store %arg7[%c0_38, %c0_39], %72 {strides = array<i32>} : memref<8x128xf32, #tpu.memory_space<vmem>>, vector<8x128xf32>,
    } else {
    }
    %c0 = arith.constant 0 : index
    %c0_1 = arith.constant 0 : index
    %3 = vector.load %arg2[%c0, %c0_1] : memref<8x128xf32, #tpu.memory_space<vmem>>, vector<8x128xf32>
    %c0_2 = arith.constant 0 : index
    %c0_3 = arith.constant 0 : index
    %4 = vector.load %arg3[%c0_2, %c0_3] : memref<8x128xf32, #tpu.memory_space<vmem>>, vector<8x128xf32>
    %c1_i32 = arith.constant 1 : i32
    %5 = arith.muli %arg0, %c1_i32 : i32
    %6 = arith.addi %5, %arg1 : i32
    %c2_i32 = arith.constant 2 : i32
    %7 = arith.cmpi slt, %6, %c2_i32 : i32
    %c1024_i32 = arith.constant 1024 : i32
    %8 = arith.muli %6, %c1024_i32 : i32
    %c1300_i32 = arith.constant 1300 : i32
    %9 = arith.subi %c1300_i32, %8 : i32
    %c0_i32_4 = arith.constant 0 : i32
    %10 = arith.select %7, %9, %c0_i32_4 : i32
    %11 = tpu.iota {dimensions = array<i32: 0>} : vector<8x128xi32>
    %12 = tpu.iota {dimensions = array<i32: 1>} : vector<8x128xi32>
    %c128_i32 = arith.constant 128 : i32
    %13 = vector.broadcast %c128_i32 : i32 to vector<8x128xi32>
    %14 = arith.muli %11, %13 : vector<8x128xi32>
    %15 = arith.addi %14, %12 : vector<8x128xi32>
    %16 = vector.broadcast %10 : i32 to vector<8x128xi32>
    %17 = arith.cmpi slt, %15, %16 : vector<8x128xi32>
    %18 = arith.extui %17 : vector<8x128xi1> to vector<8x128xi32>
    %19 = arith.sitofp %18 : vector<8x128xi32> to vector<8x128xf32>
    %cst = arith.constant 0.000000e+00 : f32
    %20 = vector.broadcast %cst : f32 to vector<8x128xf32>
    %21 = arith.select %17, %3, %20 : vector<8x128xi1>, vector<8x128xf32>
    %cst_5 = arith.constant 0.000000e+00 : f32
    %22 = vector.broadcast %cst_5 : f32 to vector<8x128xf32>
    %23 = arith.select %17, %4, %22 : vector<8x128xi1>, vector<8x128xf32>
    %24 = math.absf %21 : vector<8x128xf32>
    %cst_6 = arith.constant 0.000000e+00 : f32
    %25 = vector.broadcast %cst_6 : f32 to vector<8x128xf32>
    %26 = arith.maximumf %21, %25 : vector<8x128xf32>
    %27 = arith.mulf %21, %23 : vector<8x128xf32>
    %28 = arith.subf %26, %27 : vector<8x128xf32>
    %cst_7 = arith.constant 0.000000e+00 : f32
    %29 = vector.broadcast %cst_7 : f32 to vector<8x128xf32>
    %30 = arith.subf %29, %24 : vector<8x128xf32>
    %31 = math.exp %30 : vector<8x128xf32>
    %32 = math.log1p %31 : vector<8x128xf32>
    %33 = arith.addf %28, %32 : vector<8x128xf32>
    %34 = arith.mulf %33, %19 : vector<8x128xf32>
    %cst_8 = arith.constant 5.000000e-01 : f32
    %35 = vector.broadcast %cst_8 : f32 to vector<8x128xf32>
    %36 = arith.mulf %35, %24 : vector<8x128xf32>
    %37 = math.tanh %36 : vector<8x128xf32>
    %cst_9 = arith.constant 0.000000e+00 : f32
    %38 = vector.broadcast %cst_9 : f32 to vector<8x128xf32>
    %39 = arith.cmpf ogt, %21, %38 : vector<8x128xf32>
    %40 = arith.extui %39 : vector<8x128xi1> to vector<8x128xi32>
    %41 = arith.sitofp %40 : vector<8x128xi32> to vector<8x128xf32>
    %42 = arith.cmpf oeq, %41, %23 : vector<8x128xf32>
    %cst_10 = arith.constant 0.000000e+00 : f32
    %43 = vector.broadcast %cst_10 : f32 to vector<8x128xf32>
    %44 = arith.select %42, %43, %37 : vector<8x128xi1>, vector<8x128xf32>
    %cst_11 = arith.constant 1.000000e-01 : f32
    %45 = vector.broadcast %cst_11 : f32 to vector<8x128xf32>
    %46 = arith.mulf %44, %45 : vector<8x128xf32>
    %47 = arith.mulf %34, %46 : vector<8x128xf32>
    %c0_12 = arith.constant 0 : index
    %c0_13 = arith.constant 0 : index
    %48 = vector.load %arg6[%c0_12, %c0_13] : memref<8x128xf32, #tpu.memory_space<vmem>>, vector<8x128xf32>
    %49 = vector.shape_cast %34 : vector<8x128xf32> to vector<1x8x128xf32>
    %cst_14 = arith.constant dense<0.000000e+00> : vector<8x128xf32>
    %50 = vector.multi_reduction <add>, %49, %cst_14 [0] : vector<1x8x128xf32> to vector<8x128xf32>
    %51 = arith.addf %48, %50 : vector<8x128xf32>
    %c0_15 = arith.constant 0 : index
    %c0_16 = arith.constant 0 : index
    %52 = vector.load %arg6[%c0_15, %c0_16] : memref<8x128xf32, #tpu.memory_space<vmem>>, vector<8x128xf32>
    tpu.vector_store %arg6[%c0_15, %c0_16], %51 {strides = array<i32>} : memref<8x128xf32, #tpu.memory_space<vmem>>, vector<8x128xf32>,
    %c0_17 = arith.constant 0 : index
    %c0_18 = arith.constant 0 : index
    %53 = vector.load %arg8[%c0_17, %c0_18] : memref<8x128xf32, #tpu.memory_space<vmem>>, vector<8x128xf32>
    %54 = vector.shape_cast %47 : vector<8x128xf32> to vector<1x8x128xf32>
    %cst_19 = arith.constant dense<0.000000e+00> : vector<8x128xf32>
    %55 = vector.multi_reduction <add>, %54, %cst_19 [0] : vector<1x8x128xf32> to vector<8x128xf32>
    %56 = arith.addf %53, %55 : vector<8x128xf32>
    %c0_20 = arith.constant 0 : index
    %c0_21 = arith.constant 0 : index
    %57 = vector.load %arg8[%c0_20, %c0_21] : memref<8x128xf32, #tpu.memory_space<vmem>>, vector<8x128xf32>
    tpu.vector_store %arg8[%c0_20, %c0_21], %56 {strides = array<i32>} : memref<8x128xf32, #tpu.memory_space<vmem>>, vector<8x128xf32>,
    %c0_22 = arith.constant 0 : index
    %c0_23 = arith.constant 0 : index
    %58 = vector.load %arg4[%c0_22, %c0_23] : memref<8x128xf32, #tpu.memory_space<vmem>>, vector<8x128xf32>
    %59 = arith.mulf %58, %19 : vector<8x128xf32>
    %c0_24 = arith.constant 0 : index
    %c0_25 = arith.constant 0 : index
    %60 = vector.load %arg7[%c0_24, %c0_25] : memref<8x128xf32, #tpu.memory_space<vmem>>, vector<8x128xf32>
    %61 = vector.shape_cast %59 : vector<8x128xf32> to vector<1x8x128xf32>
    %cst_26 = arith.constant dense<0.000000e+00> : vector<8x128xf32>
    %62 = vector.multi_reduction <add>, %61, %cst_26 [0] : vector<1x8x128xf32> to vector<8x128xf32>
    %63 = arith.addf %60, %62 : vector<8x128xf32>
    %c0_27 = arith.constant 0 : index
    %c0_28 = arith.constant 0 : index
    %64 = vector.load %arg7[%c0_27, %c0_28] : memref<8x128xf32, #tpu.memory_space<vmem>>, vector<8x128xf32>
    tpu.vector_store %arg7[%c0_27, %c0_28], %63 {strides = array<i32>} : memref<8x128xf32, #tpu.memory_space<vmem>>, vector<8x128xf32>,
    %c0_i32_29 = arith.constant 0 : i32
    %65 = arith.cmpi eq, %arg1, %c0_i32_29 : i32
    %66 = arith.extui %65 : i1 to i32
    %c0_i32_30 = arith.constant 0 : i32
    %67 = arith.cmpi ne, %66, %c0_i32_30 : i32
    scf.if %67 {
      %c0_31 = arith.constant 0 : index
      %c0_32 = arith.constant 0 : index
      %68 = vector.load %arg6[%c0_31, %c0_32] : memref<8x128xf32, #tpu.memory_space<vmem>>, vector<8x128xf32>
      %c0_33 = arith.constant 0 : index
      %c0_34 = arith.constant 0 : index
      %c0_35 = arith.constant 0 : index
      %c0_36 = arith.constant 0 : index
      %69 = vector.load %arg5[%c0_33, %c0_34, %c0_35, %c0_36] : memref<1x3x8x128xf32, #tpu.memory_space<vmem>>, vector<1x1x8x128xf32>
      %70 = vector.shape_cast %69 : vector<1x1x8x128xf32> to vector<8x128xf32>
      %71 = vector.shape_cast %68 : vector<8x128xf32> to vector<1x1x8x128xf32>
      tpu.vector_store %arg5[%c0_33, %c0_34, %c0_35, %c0_36], %71 {strides = array<i32>} : memref<1x3x8x128xf32, #tpu.memory_space<vmem>>, vector<1x1x8x128xf32>,
      %c0_37 = arith.constant 0 : index
      %c0_38 = arith.constant 0 : index
      %72 = vector.load %arg7[%c0_37, %c0_38] : memref<8x128xf32, #tpu.memory_space<vmem>>, vector<8x128xf32>
      %c0_39 = arith.constant 0 : index
      %c1 = arith.constant 1 : index
      %c0_40 = arith.constant 0 : index
      %c0_41 = arith.constant 0 : index
      %73 = vector.load %arg5[%c0_39, %c1, %c0_40, %c0_41] : memref<1x3x8x128xf32, #tpu.memory_space<vmem>>, vector<1x1x8x128xf32>
      %74 = vector.shape_cast %73 : vector<1x1x8x128xf32> to vector<8x128xf32>
      %75 = vector.shape_cast %72 : vector<8x128xf32> to vector<1x1x8x128xf32>
      tpu.vector_store %arg5[%c0_39, %c1, %c0_40, %c0_41], %75 {strides = array<i32>} : memref<1x3x8x128xf32, #tpu.memory_space<vmem>>, vector<1x1x8x128xf32>,
      %c0_42 = arith.constant 0 : index
      %c0_43 = arith.constant 0 : index
      %76 = vector.load %arg8[%c0_42, %c0_43] : memref<8x128xf32, #tpu.memory_space<vmem>>, vector<8x128xf32>
      %c0_44 = arith.constant 0 : index
      %c2 = arith.constant 2 : index
      %c0_45 = arith.constant 0 : index
      %c0_46 = arith.constant 0 : index
      %77 = vector.load %arg5[%c0_44, %c2, %c0_45, %c0_46] : memref<1x3x8x128xf32, #tpu.memory_space<vmem>>, vector<1x1x8x128xf32>
      %78 = vector.shape_cast %77 : vector<1x1x8x128xf32> to vector<8x128xf32>
      %79 = vector.shape_cast %76 : vector<8x128xf32> to vector<1x1x8x128xf32>
      tpu.vector_store %arg5[%c0_44, %c2, %c0_45, %c0_46], %79 {strides = array<i32>} : memref<1x3x8x128xf32, #tpu.memory_space<vmem>>, vector<1x1x8x128xf32>,
    } else {
    }
    return
  }
  func.func @transform_0(%arg0: i32, %arg1: i32) -> (i32, i32) {
    %c1_i32 = arith.constant 1 : i32
    %0 = arith.muli %arg0, %c1_i32 : i32
    %1 = arith.addi %0, %arg1 : i32
    %c1_i32_0 = arith.constant 1 : i32
    %2 = arith.minsi %1, %c1_i32_0 : i32
    %c0_i32 = arith.constant 0 : i32
    %c0_i32_1 = arith.constant 0 : i32
    return %2, %c0_i32 : i32, i32
  }
  func.func @transform_1(%arg0: i32, %arg1: i32) -> (i32, i32) {
    %c1_i32 = arith.constant 1 : i32
    %0 = arith.muli %arg0, %c1_i32 : i32
    %1 = arith.addi %0, %arg1 : i32
    %c1_i32_0 = arith.constant 1 : i32
    %2 = arith.minsi %1, %c1_i32_0 : i32
    %c0_i32 = arith.constant 0 : i32
    %c0_i32_1 = arith.constant 0 : i32
    return %2, %c0_i32 : i32, i32
  }
  func.func @transform_2(%arg0: i32, %arg1: i32) -> (i32, i32) {
    %c1_i32 = arith.constant 1 : i32
    %0 = arith.muli %arg0, %c1_i32 : i32
    %1 = arith.addi %0, %arg1 : i32
    %c1_i32_0 = arith.constant 1 : i32
    %2 = arith.minsi %1, %c1_i32_0 : i32
    %c0_i32 = arith.constant 0 : i32
    %c0_i32_1 = arith.constant 0 : i32
    return %2, %c0_i32 : i32, i32
  }
  func.func @transform_3(%arg0: i32, %arg1: i32) -> (i32, i32, i32, i32) {
    %c0_i32 = arith.constant 0 : i32
    %c0_i32_0 = arith.constant 0 : i32
    %c0_i32_1 = arith.constant 0 : i32
    %c0_i32_2 = arith.constant 0 : i32
    return %arg0, %c0_i32, %c0_i32_0, %c0_i32_1 : i32, i32, i32, i32
  }
}

</mosaic_0001>

<bundles_post_ra>
// kernel: tpu_custom_call.1
= control target key start
LH: loop header
LB: loop body
LE: loop exit
PB: predicated region body
PF: predicated region fallthrough
CT: control target
= control target key end

     0   :  { %s1090_s0 = inlined_call_operand.hbm [shape: f32[16,128], index: 0, kind: input, shape index: {}]   ;;  %s1091_s1 = inlined_call_operand.hbm [shape: f32[16,128], index: 1, kind: input, shape index: {}]   ;;  %s1092_s2 = inlined_call_operand.hbm [shape: f32[16,128], index: 2, kind: input, shape index: {}]   ;;  %s1093_s3 = inlined_call_operand.hbm [shape: f32[2,3,8,128], index: 3, kind: output, shape index: {}]  }
   0x1   :  { %1098 = sst [smem:[#allocation21_spill]] %s1091_s1 }
   0x2   :  { %8 = vsyncpa [#allocation6], 0 }
   0x3   :  { %10 = vsyncpa [#allocation6 + $0x1], 0 }
   0x4   :  { %11 = vsyncpa [#allocation9], 0 }
   0x5   :  { %13 = vsyncpa [#allocation9 + $0x1], 0 }
   0x6   :  { %14 = vsyncpa [#allocation7], 0 }
   0x7   :  { %16 = vsyncpa [#allocation7 + $0x1], 0  ;;  %s883_s12 = smov 0   ;;  %s885_s13 = smov 0  }
   0x8   :  { %s887_s14 = smov 0   ;;  %s889_s15 = smov 0  }
   0x9   :  { %s891_s16 = smov 0   ;;  %s893_s17 = smov 0  }
   0xa   :  { %s895_s18 = smov 0   ;;  %s897_s19 = smov 0  }
   0xb   :  { %s899_s20 = smov 0  }
   0xc LB: > { %1099 = sst [smem:[#allocation15_spill]] %s834_s14  ;;  %s927_s21 = sadd.s32 4294967295, %s858_s20   ;;  %s858_s20 = sphi %s899_s20, %s22_s20   ;;  %s854_s19 = sphi %s897_s19, %s1119_s19   ;;  %s850_s18 = sphi %s895_s18, %s1118_s18   ;;  %s846_s17 = sphi %s893_s17, %s1117_s17   ;;  %s842_s16 = sphi %s891_s16, %s1123_s16   ;;  %s838_s15 = sphi %s889_s15, %s1122_s15   ;;  %s834_s14 = sphi %s887_s14, %s1115_s14   ;;  %s830_s13 = sphi %s885_s13, %s1121_s13   ;;  %s826_s12 = sphi %s883_s12, %s1120_s12  }
   0xd   : > { %1100 = sst [smem:[#allocation16_spill]] %s846_s17  ;;  %s530_s22 = sadd.s32 4294967294, %s858_s20  }
   0xe   : > { %1101 = sst [smem:[#allocation17_spill]] %s854_s19  ;;  %s34_s23 = sadd.s32 1, %s854_s19 }
   0xf   : > { %p39_p0 = scmp.lt.s32.totalorder %s854_s19, 1  ;;  %p36_p1 = scmp.ge.s32.totalorder %s34_s23, 2 }
  0x10   : > { %s47_s24 = sadd.s32 1, %s846_s17  ;;  %p54_p2 = scmp.ne.s32.totalorder %s846_s17, %s842_s16 }
  0x11   : > { %s40_s25 = scalar_select %p39_p0, %s854_s19, 1 }
  0x12   : > { %s1125_s23 = smov (%p36_p1, %s34_s23), 0  ;;  %p55_p3 = scmp.eq.s32.totalorder %s858_s20, 0 }
  0x13   : > { %1102 = sst [smem:[#allocation18_spill]] %s1125_s23  ;;  %p42_p4 = scmp.lt.s32.totalorder %s1125_s23, 1 }
  0x14   : > { %p60_p5 = scmp.ne.s32.totalorder %s842_s16, %s838_s15  ;;  %p941_p6 = por %p55_p3, %p54_p2 }
  0x15   : > { %p61_p7 = scmp.eq.s32.totalorder %s927_s21, 0  ;;  %s134_s29 = ssub.s32 %s854_s19, %s1125_s23 }
  0x16   : > { %s43_s27 = scalar_select %p42_p4, %s1125_s23, 1 }
  0x17   : > { %p947_p8 = por %p61_p7, %p60_p5  ;;  %p135_p9 = scmp.eq.s32.totalorder %s134_s29, 0 }
  0x18   : > { %s44_s30 = ssub.s32 %s40_s25, %s43_s27  ;;  %s137_s4 = sadd.s32 1, %s834_s14 }
  0x19   : > { %p45_p10 = scmp.eq.s32.totalorder %s44_s30, 0  ;;  %p147_p11 = scmp.ne.s32.totalorder %s834_s14, %s830_s13 }
  0x1a   : > { %s955_s5 = scalar_select %p135_p9, %s834_s14, %s137_s4  }
  0x1b   : > { %s958_s6 = scalar_select %p45_p10, %s846_s17, %s47_s24  }
  0x1c   : > { %1105 = sst [smem:[#allocation19_spill]] %s955_s5  ;;  %p148_p12 = scmp.eq.s32.totalorder %s927_s21, 1 }
  0x1d   : > { %1106 = sst [smem:[#allocation20_spill]] %s958_s6  ;;  %p153_p13 = scmp.ne.s32.totalorder %s830_s13, %s826_s12 }
  0x1e   : > { %p154_p0 = scmp.eq.s32.totalorder %s530_s22, 1  ;;  %p965_p1 = por %p148_p12, %p147_p11 }
  0x1f   : > { %p532_p2 = scmp.ge.s32.totalorder %s858_s20, 2  ;;  %p575_p4 = scmp.lt.s32.totalorder %s858_s20, 2 }
  0x20   : > { %p970_p3 = por %p154_p0, %p153_p13  ;;  %s174_s9 = sand.u32 1, %s846_s17  }
  0x21   : > { %s534_s10 = sshll.u32 %s40_s25, 3  ;;  %s533_s11 = sshll.u32 %s174_s9, 3 }
  0x22   : > { %p978_p5 = pnand %p575_p4, %p941_p6  ;;  %s196_s22 = sand.u32 1, %s858_s20  }
  0x23   : > { %s1110_s1 = sld [smem:[#allocation21_spill]]  ;;  %s200_s30 = scalar_lea.vmem [#allocation8], %s533_s11 }
  0x24   : > { %s211_s4 = sshll.u32 %s200_s30, 4  ;;  %p539_p7 = scmp.ge.s32.totalorder %s858_s20, 1  ;;  %s212_s4 = int_to_ptr.vmem [resolvable:$true] %s211_s4 }
  0x25   : > { %s197_s25 = scalar_lea.sflag [#allocation9], %s196_s22  ;;  %p238_p6 = scmp.lt.s32.totalorder %s858_s20, 3 }
  0x26   : > { %s185_s24 = scalar_lea.hbm %s1090_s0, %s534_s10  ;;  %s178_s27 = scalar_lea.vmem [#allocation5], %s533_s11 }
  0x27   : > { %p990_p9 = pnand %p539_p7, %p238_p6  ;;  %s189_s30 = sshll.u32 %s178_s27, 4  ;;  %s190_s30 = int_to_ptr.vmem [resolvable:$true] %s189_s30 }
  0x28   : > { %s222_s17 = scalar_lea.vmem [#allocation10], %s533_s11  ;;  %s244_s19 = sand.u32 (!%p990_p9), 1, %s842_s16  }
  0x29   : > { %s207_s29 = scalar_lea.hbm %s1110_s1, %s534_s10  ;;  %s187_s1 = sshll.u32 %s185_s24, 4  ;;  %s188_s1 = int_to_ptr.hbm [resolvable:$true] %s187_s1 }
  0x2a   : > { %s209_s23 = sshll.u32 %s207_s29, 4  ;;  %s175_s29 = scalar_lea.sflag [#allocation6], %s174_s9  ;;  %s210_s23 = int_to_ptr.hbm [resolvable:$true] %s209_s23 }
  0x2b   : > { %567 = dma.hbm_to_vmem [thread:$0]  (!%p978_p5), %s210_s23, 128, %s212_s4, %s197_s25  }
  0x2c   : > { %564 = dma.hbm_to_vmem [thread:$0]  (!%p978_p5), %s188_s1, 128, %s190_s30, %s175_s29  }
  0x2d   : > { %s229_s4 = scalar_lea.hbm %s1092_s2, %s534_s10  ;;  %s233_s5 = sshll.u32 %s222_s17, 4  ;;  %s234_s5 = int_to_ptr.vmem [resolvable:$true] %s233_s5 }
  0x2e   : > { %s231_s14 = sshll.u32 %s229_s4, 4  ;;  %242 = sbr.rel (%p990_p9) target bundleno = 100 (0x64), region = 32  ;;  %s232_s14 = int_to_ptr.hbm [resolvable:$true] %s231_s14 }
  0x2f   : > { %570 = dma.hbm_to_vmem [thread:$0]  (!%p978_p5), %s232_s14, 128, %s234_s5, %s197_s25  }
  0x30   : > { %s1007_s6 = sshll.u32 (!%p990_p9), %s244_s19, 3  ;;  %s245_s1 = scalar_lea.sflag (!%p990_p9), [#allocation6], %s244_s19 }
  0x31   : > { %s248_s9 = scalar_lea.vmem (!%p990_p9), [#allocation5], %s1007_s6 }
  0x33   : > { %813 = dma.done.wait (%p947_p8), %s245_s1, 128  }
  0x34   : > { %815 = vsyncadd (%p947_p8), %s245_s1, 4294967168  ;;  %s254_s14 = sand.u32 1, %s927_s21   ;;  %s258_s5 = scalar_lea.vmem [#allocation8], %s1007_s6 }
  0x35   : > { %s255_s17 = scalar_lea.sflag [#allocation9], %s254_s14 }
  0x36   : > { %817 = dma.done.wait (%p947_p8), %s255_s17, 256  }
  0x37   : > { %819 = vsyncadd (%p947_p8), %s255_s17, 4294967040  ;;  %p321_p10 = scmp.lt.s32.totalorder %s850_s18, 2  ;;  %v325_v0 = vlaneseq  ;;  %s543_s10 = sshll.u32 %s850_s18, 10  ;;  %v318_v6 = vld [vmem:[%s248_s9] sm:$0xff]  ;;  %v860_v10 = vmov 0.0   ;;  %v319_v17 = vld [vmem:[%s258_s5] sm:$0xff] }
  0x38   : > { %s323_s11 = ssub.s32 1300, %s543_s10  ;;  %s299_s15 = sand.u32 1, %s830_s13  }
  0x39   : > { %v326_v1 = vshrl.u32 %v325_v0, 7  ;;  %v328_v2 = vand.u32 127, %v325_v0  ;;  %s1127_s11 = smov (!%p321_p10, %s323_s11), 0  ;;  %s551_s21 = smul.u32 24, %s299_s15 }
  0x3a   : > { %v331_v5 = vstv %s1127_s11  ;;  %s268_s28 = scalar_lea.vmem [#allocation10], %s1007_s6  ;;  %s552_s26 = smul.u32 24, %s850_s18 }
  0x3b   : > { %v329_v3 = vmul.u32 128, %v326_v1  ;;  %v372_v8 = vld [vmem:[%s268_s28] sm:$0xff]  ;;  %s1034_s25 = scalar_lea.vmem [#allocation11], %s551_s21  ;;  %s390_s18 = scalar_lea.sflag [#allocation7], %s299_s15 }
  0x3c   : > { %s401_s30 = scalar_lea.hbm %s1093_s3, %s552_s26  ;;  %s402_s29 = sshll.u32 %s1034_s25, 4  ;;  %s403_s29 = int_to_ptr.vmem [resolvable:$true] %s402_s29 }
  0x3d   : > { %v330_v4 = vadd.s32 %v329_v3, %v328_v2  ;;  %s404_s22 = sshll.u32 %s401_s30, 4  ;;  %s768_s1 = scalar_lea.hbm %s1093_s3, 48  ;;  %s405_s22 = int_to_ptr.hbm [resolvable:$true] %s404_s22 }
  0x3e   : > { %s762_s23 = sshra.s32 %s405_s22, 4  ;;  %s763_s23 = int_to_ptr.hbm [resolvable:$true] %s762_s23 }
  0x3f   : > { %vm1025_vm0 = vcmp.lt.s32.totalorder %v330_v4, %v331_v5  ;;  %s764_s4 = scalar_lea.hbm %s763_s23, 24  ;;  %p769_p13 = scmp.lt.s32.totalorder %s763_s23, %s1093_s3 }
  0x40   : > { %v335_v9 = vsel %vm1025_vm0, %v318_v6, 0.0  ;;  %v544_v11 = vsel %vm1025_vm0, 1.0, %v860_v10  ;;  %v336_v21 = vsel %vm1025_vm0, %v319_v17, 0.0  ;;  %p765_p8 = scmp.ne.s32.totalorder %s763_s23, %s764_s4  ;;  %p770_p0 = scmp.lt.s32.totalorder %s768_s1, %s764_s4 }
  0x41   : > { %v337_v12 = vand.u32 2147483647, %v335_v9  ;;  %v373_v13 = vmul.f32 %v544_v11, %v372_v8  ;;  %vm357_vm1 = vcmp.gt.f32.partialorder %v335_v9, 0.0  ;;  %v338_v24 = vmax.f32 %v335_v9, 0.0 }
  0x42   : > { %v545_v23 = vsel %vm357_vm1, 1.0, %v860_v10  ;;  %v339_v25 = vmul.f32 %v336_v21, %v335_v9  ;;  %p766_p11 = pnand %p765_p8, %p965_p1  ;;  %p771_p4 = por %p770_p0, %p769_p13 }
  0x43   : > { %v341_v14 = vsub.f32 0.0, %v337_v12  ;;  %546 = vst [vmem:[%s1034_s25 + $0x8] sm:$0xff] %v373_v13  ;;  %v355_v16 = vmul.f32 0.5, %v337_v12  ;;  %vm360_vm2 = vcmp.eq.f32.partialorder %v545_v23, %v336_v21 }
  0x44   : > { %v340_v30 = vsub.f32 %v338_v24, %v339_v25  ;;  %p767_p12 = pneg %p766_p11 }
  0x45   : > { %v342_v15 = vmul.f32 1.442695, %v341_v14 }
  0x46   : > { %p772_p5 = pnand %p771_p4, %p767_p12 }
  0x47   : > { %652 = vpow2.f32 %v342_v15 }
  0x48   : > { %654 = vtanh.f32 %v355_v16 }
  0x4d   : > { %v653_v18 = vpop.eup %652 }
  0x4e   : > { %v344_v19 = vadd.f32 1.0, %v653_v18  ;;  %v347_v20 = vmul.f32 -0.5, %v653_v18  ;;  %v350_v26 = vand.u32 2147483647, %v653_v18  ;;  %v655_v27 = vpop.eup %654 }
  0x4f   : > { %v361_v32 = vsel %vm360_vm2, 0.0, %v655_v27 }
  0x50   : > { %656 = vlog2.f32 %v344_v19  ;;  %v348_v22 = vadd.f32 1.0, %v347_v20  ;;  %vm351_vm3 = vcmp.lt.f32.partialorder %v350_v26, 0.0004427343  ;;  %v362_v35 = vmul.f32 0.1, %v361_v32 }
  0x52   : > { %v349_v28 = vmul.f32 %v653_v18, %v348_v22 }
  0x56   : > { %v657_v29 = vpop.eup %656 }
  0x57   : > { %v346_v31 = vmul.f32 0.6931472, %v657_v29 }
  0x59   : > { %v352_v33 = vsel %vm351_vm3, %v349_v28, %v346_v31 }
  0x5a   : > { %v353_v34 = vadd.f32 %v352_v33, %v340_v30 }
  0x5c   : > { %v354_v36 = vmul.f32 %v544_v11, %v353_v34 }
  0x5e   : > { %382 = vst [vmem:[%s1034_s25] sm:$0xff] %v354_v36  ;;  %v363_v37 = vmul.f32 %v362_v35, %v354_v36 }
  0x60   : > { %547 = vst [vmem:[%s1034_s25 + $0x10] sm:$0xff] %v363_v37 }
  0x61   : > { %775 = shalt.err (!%p772_p5)
}
  0x62   : > { %s861_s17 = smov 128   ;;  %s862_s5 = smov 8  }
  0x63   : > { %559 = dma.vmem_to_hbm [thread:$0]  (%p965_p1), %s403_s29, 384, %s405_s22, %s390_s18, %s861_s17, %s861_s17, %s862_s5  }
  0x64 PF: > { %s419_s10 = sand.u32 1, %s826_s12   ;;  %p572_p7 = pnand %p532_p2, %p970_p3 }
  0x65   : > { %s420_s11 = scalar_lea.sflag [#allocation7], %s419_s10 }
  0x66   : > { %p573_p6 = pneg %p572_p7 }
  0x68   : > { %821 = dma.done.wait (%p573_p6), %s420_s11, 384  }
  0x69   : > { %823 = vsyncadd (%p573_p6), %s420_s11, 4294966912  ;;  %s22_s20 = sadd.s32 1, %s858_s20   ;;  %s1114_s15 = sld [smem:[#allocation15_spill]] }
  0x6a   : > { %p19_p9 = scmp.ge.s32.totalorder %s22_s20, 4   ;;  %s1115_s14 = sld [smem:[#allocation19_spill]] }
  0x6b   : > { %s1116_s7 = sld [smem:[#allocation16_spill]]  ;;  %s1120_s12 = smov %s830_s13 }
  0x6c   : > { %s1117_s17 = sld [smem:[#allocation20_spill]] }
  0x6d   : > { %s1118_s18 = sld [smem:[#allocation17_spill]]  ;;  %21 = sbr.rel (!%p19_p9) target bundleno = 12 (0xc), region = 111 }
  0x6e   : > { %s1119_s19 = sld [smem:[#allocation18_spill]] }
  0x6f   : > { %s1121_s13 = smov %s1114_s15  ;;  %s1122_s15 = smov %s842_s16 }
  0x71   : > { %s1123_s16 = smov %s1116_s7 }
  0x72   :  { %426 = vsyncpa [#allocation6], 1 }
  0x73   :  { %428 = vsyncpa [#allocation6 + $0x1], 1 }
  0x74   :  { %429 = vsyncpa [#allocation9], 1 }
  0x75   :  { %431 = vsyncpa [#allocation9 + $0x1], 1 }
  0x76   :  { %432 = vsyncpa [#allocation7], 1 }
  0x77   :  { %434 = vsyncpa [#allocation7 + $0x1], 1 }

</bundles_post_ra>
